<compile_context>
chip_gen: v5e
topology: v5e:2x2
jax: 0.10.0
libtpu: 0.0.40
codegen_flags: <defaults>
</compile_context>

<pallas_src>
import functools

import jax
import jax.numpy as jnp
from jax.experimental import pallas as pl
from jax.experimental.pallas import tpu as pltpu


# ------------------------- fused whole-backend kernel ----------------------- #

def _silu(x):
    return x * jax.nn.sigmoid(x)


def _backend_kernel(
        # inputs (all staged into VMEM once), channels-first [C, *] layout
        colT_ref,                      # [Cin*kh*kw, M] im2col^T of x (stem conv)
        w_stem_ref,                    # [C1, Cin*kh*kw]
        s1_ref, b1_ref,                # [C1, 1] folded BN1 scale / shift
        w_b1_ref, bb1_ref,             # block 0: BN-scale-folded 1x1 weight + shift
        w_b2_ref, bb2_ref,             # block 1: BN-scale-folded 1x1 weight + shift
        w_head_ref,                    # [C2, C1]
        s2_ref, b2_ref,                # [C2, 1] folded BN2 scale / shift
        # single fused output: 8 feature slabs stacked on the sublane axis
        out_ref,                       # [C_total, M]
        *, offs, c1, c2):
    f32 = jnp.float32

    # conv_stem (3x3 s2) as one MXU GEMM; result [C1, M] is lane-dense
    stem = jnp.dot(w_stem_ref[...], colT_ref[...], preferred_element_type=f32)
    out_ref[offs[0]:offs[0] + c1, :] = stem

    # bn1 / act1 as VPU/EUP epilogues on the VMEM-resident GEMM result
    bn1 = stem * s1_ref[...] + b1_ref[...]
    out_ref[offs[1]:offs[1] + c1, :] = bn1
    act1 = _silu(bn1)
    out_ref[offs[2]:offs[2] + c1, :] = act1

    # blocks[0]: 1x1 conv (BN scale pre-folded) -> +shift -> SiLU -> residual
    y = _silu(jnp.dot(w_b1_ref[...], act1, preferred_element_type=f32)
              + bb1_ref[...])
    blk0 = act1 + y
    out_ref[offs[3]:offs[3] + c1, :] = blk0

    # blocks[1]
    y = _silu(jnp.dot(w_b2_ref[...], blk0, preferred_element_type=f32)
              + bb2_ref[...])
    blk1 = blk0 + y
    out_ref[offs[4]:offs[4] + c1, :] = blk1

    # conv_head (1x1) -> bn2 -> act2
    head = jnp.dot(w_head_ref[...], blk1, preferred_element_type=f32)
    out_ref[offs[5]:offs[5] + c2, :] = head
    bn2 = head * s2_ref[...] + b2_ref[...]
    out_ref[offs[6]:offs[6] + c2, :] = bn2
    out_ref[offs[7]:offs[7] + c2, :] = _silu(bn2)


# ------------------------------ JAX glue ----------------------------------- #

def _im2col_t(x_nchw, kh, kw, stride, pad):
    """Returns [Cin*kh*kw, N*Ho*Wo]; K ordering c*kh*kw + ki*kw + kj matches
    w.reshape(Cout, -1)."""
    N, C, H, W = x_nchw.shape
    xp = jnp.pad(x_nchw, ((0, 0), (0, 0), (pad, pad), (pad, pad)))
    Ho = (H + 2 * pad - kh) // stride + 1
    Wo = (W + 2 * pad - kw) // stride + 1
    cols = []
    for ki in range(kh):
        for kj in range(kw):
            cols.append(xp[:, :, ki:ki + stride * Ho:stride,
                               kj:kj + stride * Wo:stride])     # [N, C, Ho, Wo]
    col = jnp.stack(cols, axis=2)                               # [N, C, kh*kw, Ho, Wo]
    col = col.reshape(N, C * kh * kw, Ho, Wo)
    colT = col.transpose(1, 0, 2, 3).reshape(C * kh * kw, N * Ho * Wo)
    return colT, Ho, Wo


def _fold_bn(gamma, beta, mean, var, eps=1e-5):
    scale = gamma / jnp.sqrt(var + eps)
    shift = beta - mean * scale
    return scale.reshape(-1, 1), shift.reshape(-1, 1)           # [C, 1]


def _slab_layout(c1, c2):
    sizes = (c1, c1, c1, c1, c1, c2, c2, c2)
    offs, o = [], 0
    for s in sizes:
        offs.append(o)
        o += s
    return tuple(offs), sizes, o


def encoder_effnet_forward(x, params):
    """Mirrors Encoder_EffNet.forward: returns
    [x, conv_stem, bn1, act1, blocks[0], blocks[1], conv_head, bn2, act2]
    as NCHW feature maps."""
    N, Cin, H, W = x.shape
    C1 = params["w_stem"].shape[0]
    C2 = params["w_head"].shape[0]

    # im2col once for the 3x3/stride-2 stem; every other conv is 1x1 and runs
    # directly on the channels-first [C, M] slab inside the kernel.
    # TODO(synk): fuse im2col into the kernel (strided DMA gather) for
    # real-resolution inputs; at 2x4x16x16 the XLA im2col is negligible.
    colT, Ho, Wo = _im2col_t(x, 3, 3, 2, 1)
    M = N * Ho * Wo

    w_stem = params["w_stem"].reshape(C1, Cin * 9)              # [C1, 36]
    s1, b1 = _fold_bn(*params["bn1"])
    sb1, bb1 = _fold_bn(*params["bn_blk1"])
    sb2, bb2 = _fold_bn(*params["bn_blk2"])
    s2, b2 = _fold_bn(*params["bn2"])

    # fold the per-out-channel BN scale of each block into its 1x1 conv weight
    # (only the post-residual block outputs are collected, so this is exact)
    w_b1 = sb1 * params["w_blk1"].reshape(C1, C1)
    w_b2 = sb2 * params["w_blk2"].reshape(C1, C1)
    w_head = params["w_head"].reshape(C2, C1)

    offs, sizes, c_total = _slab_layout(C1, C2)

    vmem = pl.BlockSpec(memory_space=pltpu.MemorySpace.VMEM)
    kern = functools.partial(_backend_kernel, offs=offs, c1=C1, c2=C2)
    slab = pl.pallas_call(
        kern,
        out_shape=jax.ShapeDtypeStruct((c_total, M), jnp.float32),
        in_specs=[vmem] * 11,
        out_specs=vmem,
    )(colT, w_stem, s1, b1, w_b1, bb1, w_b2, bb2, w_head, s2, b2)

    # one NCHW conversion per *collected* feature, outside the kernel
    features = [x]
    for off, c in zip(offs, sizes):
        f = slab[off:off + c].reshape(c, N, Ho, Wo).transpose(1, 0, 2, 3)
        features.append(f)
    return features


# --------------------------- synthetic backend ------------------------------ #

def build_backend_params(key, c_in=4, c_stem=32, c_head=64):
    ks = jax.random.split(key, 8)

    def bn_params(k, c):
        k1, k2, k3, k4 = jax.random.split(k, 4)
        gamma = 1.0 + 0.05 * jax.random.normal(k1, (c,), jnp.float32)
        beta = 0.05 * jax.random.normal(k2, (c,), jnp.float32)
        mean = 0.05 * jax.random.normal(k3, (c,), jnp.float32)
        var = 1.0 + 0.05 * jnp.abs(jax.random.normal(k4, (c,), jnp.float32))
        return (gamma, beta, mean, var)

    return {
        "w_stem": 0.1 * jax.random.normal(ks[0], (c_stem, c_in, 3, 3), jnp.float32),
        "w_blk1": 0.1 * jax.random.normal(ks[1], (c_stem, c_stem, 1, 1), jnp.float32),
        "w_blk2": 0.1 * jax.random.normal(ks[2], (c_stem, c_stem, 1, 1), jnp.float32),
        "w_head": 0.1 * jax.random.normal(ks[3], (c_head, c_stem, 1, 1), jnp.float32),
        "bn1": bn_params(ks[4], c_stem),
        "bn_blk1": bn_params(ks[5], c_stem),
        "bn_blk2": bn_params(ks[6], c_stem),
        "bn2": bn_params(ks[7], c_head),
    }


# --------------------------- pure-JAX reference ----------------------------- #

def _reference_forward(x, params, eps=1e-5):
    def conv(x, w, stride, pad):
        return jax.lax.conv_general_dilated(
            x, w, (stride, stride), [(pad, pad), (pad, pad)],
            dimension_numbers=("NCHW", "OIHW", "NCHW"),
            precision=jax.lax.Precision.HIGHEST)

    def bn(x, p):
        gamma, beta, mean, var = p
        scale = gamma / jnp.sqrt(var + eps)
        shift = beta - mean * scale
        return x * scale.reshape(1, -1, 1, 1) + shift.reshape(1, -1, 1, 1)

    def silu(x):
        return x * jax.nn.sigmoid(x)

    feats = [x]
    y = conv(x, params["w_stem"], 2, 1); feats.append(y)
    y = bn(y, params["bn1"]); feats.append(y)
    y = silu(y); feats.append(y)
    for wk, bk in (("w_blk1", "bn_blk1"), ("w_blk2", "bn_blk2")):
        z = silu(bn(conv(y, params[wk], 1, 0), params[bk]))
        y = y + z
        feats.append(y)
    y = conv(y, params["w_head"], 1, 0); feats.append(y)
    y = bn(y, params["bn2"]); feats.append(y)
    y = silu(y); feats.append(y)
    return feats


# ----------------------------------- main ----------------------------------- #

if __name__ == "__main__":
    key = jax.random.PRNGKey(0)
    k_in, k_params = jax.random.split(key)

    # small NCHW input consistent with the module: batch=2, channels=4, 16x16
    x = jax.random.normal(k_in, (2, 4, 16, 16), jnp.float32)
    params = build_backend_params(k_params)

    fwd = jax.jit(encoder_effnet_forward)
    feats = fwd(x, params)
    feats = [jax.block_until_ready(f) for f in feats]

    expected_shapes = [
        (2, 4, 16, 16),   # input
        (2, 32, 8, 8),    # conv_stem
        (2, 32, 8, 8),    # bn1
        (2, 32, 8, 8),    # act1
        (2, 32, 8, 8),    # blocks[0]
        (2, 32, 8, 8),    # blocks[1]
        (2, 64, 8, 8),    # conv_head
        (2, 64, 8, 8),    # bn2
        (2, 64, 8, 8),    # act2
    ]
    assert len(feats) == len(expected_shapes)
    for f, s in zip(feats, expected_shapes):
        assert f.shape == s, (f.shape, s)
        assert f.dtype == jnp.float32
        assert bool(jnp.all(jnp.isfinite(f)))

    # numerical check against a pure-JAX reference (loose tol: matmul precision
    # modes may differ between XLA conv and the in-kernel MXU GEMM)
    refs = _reference_forward(x, params)
    for i, (f, r) in enumerate(zip(feats, refs)):
        assert bool(jnp.allclose(f, r, atol=2e-2, rtol=2e-2)), (
            i, float(jnp.max(jnp.abs(f - r))))

    print("KERNEL_OK")
</pallas_src>

<mosaic_0001>
module attributes {stable_mosaic.version = 11 : i64} {
  func.func @_backend_kernel(%arg0: memref<36x128xf32, #tpu.memory_space<vmem>>, %arg1: memref<32x36xf32, #tpu.memory_space<vmem>>, %arg2: memref<32x1xf32, #tpu.memory_space<vmem>>, %arg3: memref<32x1xf32, #tpu.memory_space<vmem>>, %arg4: memref<32x32xf32, #tpu.memory_space<vmem>>, %arg5: memref<32x1xf32, #tpu.memory_space<vmem>>, %arg6: memref<32x32xf32, #tpu.memory_space<vmem>>, %arg7: memref<32x1xf32, #tpu.memory_space<vmem>>, %arg8: memref<64x32xf32, #tpu.memory_space<vmem>>, %arg9: memref<64x1xf32, #tpu.memory_space<vmem>>, %arg10: memref<64x1xf32, #tpu.memory_space<vmem>>, %arg11: memref<352x128xf32, #tpu.memory_space<vmem>>) attributes {dimension_semantics = [], scalar_prefetch = 0 : i64, scratch_operands = 0 : i64, tpu.core_type = #tpu.core_type<tc>} {
    %c0 = arith.constant 0 : index
    %c0_0 = arith.constant 0 : index
    %0 = vector.load %arg1[%c0, %c0_0] : memref<32x36xf32, #tpu.memory_space<vmem>>, vector<32x36xf32>
    %c0_1 = arith.constant 0 : index
    %c0_2 = arith.constant 0 : index
    %1 = vector.load %arg0[%c0_1, %c0_2] : memref<36x128xf32, #tpu.memory_space<vmem>>, vector<36x128xf32>
    %cst = arith.constant dense<0.000000e+00> : vector<32x128xf32>
    %2 = tpu.matmul %0, %1, %cst {dimension_numbers = #tpu.dot_dimension_numbers<[1], [0], [0], [1], [0, 0, 1, 1], [], []>} : vector<32x36xf32>, vector<36x128xf32>, vector<32x128xf32> -> vector<32x128xf32>
    %c0_3 = arith.constant 0 : index
    %c0_4 = arith.constant 0 : index
    %3 = vector.load %arg11[%c0_3, %c0_4] : memref<352x128xf32, #tpu.memory_space<vmem>>, vector<32x128xf32>
    tpu.vector_store %arg11[%c0_3, %c0_4], %2 {strides = array<i32>} : memref<352x128xf32, #tpu.memory_space<vmem>>, vector<32x128xf32>,
    %c0_5 = arith.constant 0 : index
    %c0_6 = arith.constant 0 : index
    %4 = vector.load %arg2[%c0_5, %c0_6] : memref<32x1xf32, #tpu.memory_space<vmem>>, vector<32x1xf32>
    %5 = vector.broadcast %4 : vector<32x1xf32> to vector<32x128xf32>
    %6 = arith.mulf %2, %5 : vector<32x128xf32>
    %c0_7 = arith.constant 0 : index
    %c0_8 = arith.constant 0 : index
    %7 = vector.load %arg3[%c0_7, %c0_8] : memref<32x1xf32, #tpu.memory_space<vmem>>, vector<32x1xf32>
    %8 = vector.broadcast %7 : vector<32x1xf32> to vector<32x128xf32>
    %9 = arith.addf %6, %8 : vector<32x128xf32>
    %c32 = arith.constant 32 : index
    %c0_9 = arith.constant 0 : index
    %10 = vector.load %arg11[%c32, %c0_9] : memref<352x128xf32, #tpu.memory_space<vmem>>, vector<32x128xf32>
    tpu.vector_store %arg11[%c32, %c0_9], %9 {strides = array<i32>} : memref<352x128xf32, #tpu.memory_space<vmem>>, vector<32x128xf32>,
    %11 = arith.negf %9 : vector<32x128xf32>
    %12 = math.exp %11 : vector<32x128xf32>
    %cst_10 = arith.constant 1.000000e+00 : f32
    %13 = vector.broadcast %cst_10 : f32 to vector<32x128xf32>
    %14 = arith.addf %13, %12 : vector<32x128xf32>
    %15 = arith.divf %13, %14 : vector<32x128xf32>
    %16 = arith.mulf %9, %15 : vector<32x128xf32>
    %c64 = arith.constant 64 : index
    %c0_11 = arith.constant 0 : index
    %17 = vector.load %arg11[%c64, %c0_11] : memref<352x128xf32, #tpu.memory_space<vmem>>, vector<32x128xf32>
    tpu.vector_store %arg11[%c64, %c0_11], %16 {strides = array<i32>} : memref<352x128xf32, #tpu.memory_space<vmem>>, vector<32x128xf32>,
    %c0_12 = arith.constant 0 : index
    %c0_13 = arith.constant 0 : index
    %18 = vector.load %arg4[%c0_12, %c0_13] : memref<32x32xf32, #tpu.memory_space<vmem>>, vector<32x32xf32>
    %cst_14 = arith.constant dense<0.000000e+00> : vector<32x128xf32>
    %19 = tpu.matmul %18, %16, %cst_14 {dimension_numbers = #tpu.dot_dimension_numbers<[1], [0], [0], [1], [0, 0, 1, 1], [], []>} : vector<32x32xf32>, vector<32x128xf32>, vector<32x128xf32> -> vector<32x128xf32>
    %c0_15 = arith.constant 0 : index
    %c0_16 = arith.constant 0 : index
    %20 = vector.load %arg5[%c0_15, %c0_16] : memref<32x1xf32, #tpu.memory_space<vmem>>, vector<32x1xf32>
    %21 = vector.broadcast %20 : vector<32x1xf32> to vector<32x128xf32>
    %22 = arith.addf %19, %21 : vector<32x128xf32>
    %23 = arith.negf %22 : vector<32x128xf32>
    %24 = math.exp %23 : vector<32x128xf32>
    %cst_17 = arith.constant 1.000000e+00 : f32
    %25 = vector.broadcast %cst_17 : f32 to vector<32x128xf32>
    %26 = arith.addf %25, %24 : vector<32x128xf32>
    %27 = arith.divf %25, %26 : vector<32x128xf32>
    %28 = arith.mulf %22, %27 : vector<32x128xf32>
    %29 = arith.addf %16, %28 : vector<32x128xf32>
    %c96 = arith.constant 96 : index
    %c0_18 = arith.constant 0 : index
    %30 = vector.load %arg11[%c96, %c0_18] : memref<352x128xf32, #tpu.memory_space<vmem>>, vector<32x128xf32>
    tpu.vector_store %arg11[%c96, %c0_18], %29 {strides = array<i32>} : memref<352x128xf32, #tpu.memory_space<vmem>>, vector<32x128xf32>,
    %c0_19 = arith.constant 0 : index
    %c0_20 = arith.constant 0 : index
    %31 = vector.load %arg6[%c0_19, %c0_20] : memref<32x32xf32, #tpu.memory_space<vmem>>, vector<32x32xf32>
    %cst_21 = arith.constant dense<0.000000e+00> : vector<32x128xf32>
    %32 = tpu.matmul %31, %29, %cst_21 {dimension_numbers = #tpu.dot_dimension_numbers<[1], [0], [0], [1], [0, 0, 1, 1], [], []>} : vector<32x32xf32>, vector<32x128xf32>, vector<32x128xf32> -> vector<32x128xf32>
    %c0_22 = arith.constant 0 : index
    %c0_23 = arith.constant 0 : index
    %33 = vector.load %arg7[%c0_22, %c0_23] : memref<32x1xf32, #tpu.memory_space<vmem>>, vector<32x1xf32>
    %34 = vector.broadcast %33 : vector<32x1xf32> to vector<32x128xf32>
    %35 = arith.addf %32, %34 : vector<32x128xf32>
    %36 = arith.negf %35 : vector<32x128xf32>
    %37 = math.exp %36 : vector<32x128xf32>
    %cst_24 = arith.constant 1.000000e+00 : f32
    %38 = vector.broadcast %cst_24 : f32 to vector<32x128xf32>
    %39 = arith.addf %38, %37 : vector<32x128xf32>
    %40 = arith.divf %38, %39 : vector<32x128xf32>
    %41 = arith.mulf %35, %40 : vector<32x128xf32>
    %42 = arith.addf %29, %41 : vector<32x128xf32>
    %c128 = arith.constant 128 : index
    %c0_25 = arith.constant 0 : index
    %43 = vector.load %arg11[%c128, %c0_25] : memref<352x128xf32, #tpu.memory_space<vmem>>, vector<32x128xf32>
    tpu.vector_store %arg11[%c128, %c0_25], %42 {strides = array<i32>} : memref<352x128xf32, #tpu.memory_space<vmem>>, vector<32x128xf32>,
    %c0_26 = arith.constant 0 : index
    %c0_27 = arith.constant 0 : index
    %44 = vector.load %arg8[%c0_26, %c0_27] : memref<64x32xf32, #tpu.memory_space<vmem>>, vector<64x32xf32>
    %cst_28 = arith.constant dense<0.000000e+00> : vector<64x128xf32>
    %45 = tpu.matmul %44, %42, %cst_28 {dimension_numbers = #tpu.dot_dimension_numbers<[1], [0], [0], [1], [0, 0, 1, 1], [], []>} : vector<64x32xf32>, vector<32x128xf32>, vector<64x128xf32> -> vector<64x128xf32>
    %c160 = arith.constant 160 : index
    %c0_29 = arith.constant 0 : index
    %46 = vector.load %arg11[%c160, %c0_29] : memref<352x128xf32, #tpu.memory_space<vmem>>, vector<64x128xf32>
    tpu.vector_store %arg11[%c160, %c0_29], %45 {strides = array<i32>} : memref<352x128xf32, #tpu.memory_space<vmem>>, vector<64x128xf32>,
    %c0_30 = arith.constant 0 : index
    %c0_31 = arith.constant 0 : index
    %47 = vector.load %arg9[%c0_30, %c0_31] : memref<64x1xf32, #tpu.memory_space<vmem>>, vector<64x1xf32>
    %48 = vector.broadcast %47 : vector<64x1xf32> to vector<64x128xf32>
    %49 = arith.mulf %45, %48 : vector<64x128xf32>
    %c0_32 = arith.constant 0 : index
    %c0_33 = arith.constant 0 : index
    %50 = vector.load %arg10[%c0_32, %c0_33] : memref<64x1xf32, #tpu.memory_space<vmem>>, vector<64x1xf32>
    %51 = vector.broadcast %50 : vector<64x1xf32> to vector<64x128xf32>
    %52 = arith.addf %49, %51 : vector<64x128xf32>
    %c224 = arith.constant 224 : index
    %c0_34 = arith.constant 0 : index
    %53 = vector.load %arg11[%c224, %c0_34] : memref<352x128xf32, #tpu.memory_space<vmem>>, vector<64x128xf32>
    tpu.vector_store %arg11[%c224, %c0_34], %52 {strides = array<i32>} : memref<352x128xf32, #tpu.memory_space<vmem>>, vector<64x128xf32>,
    %54 = arith.negf %52 : vector<64x128xf32>
    %55 = math.exp %54 : vector<64x128xf32>
    %cst_35 = arith.constant 1.000000e+00 : f32
    %56 = vector.broadcast %cst_35 : f32 to vector<64x128xf32>
    %57 = arith.addf %56, %55 : vector<64x128xf32>
    %58 = arith.divf %56, %57 : vector<64x128xf32>
    %59 = arith.mulf %52, %58 : vector<64x128xf32>
    %c288 = arith.constant 288 : index
    %c0_36 = arith.constant 0 : index
    %60 = vector.load %arg11[%c288, %c0_36] : memref<352x128xf32, #tpu.memory_space<vmem>>, vector<64x128xf32>
    tpu.vector_store %arg11[%c288, %c0_36], %59 {strides = array<i32>} : memref<352x128xf32, #tpu.memory_space<vmem>>, vector<64x128xf32>,
    return
  }
}

</mosaic_0001>

<bundles_post_ra>
// kernel: encoder_effnet_forward.1
= control target key start
LH: loop header
LB: loop body
LE: loop exit
PB: predicated region body
PF: predicated region fallthrough
CT: control target
= control target key end

     0   :  { %vm60_vm0 = vcmask 1043456   ;;  %v1066_v0 = vmov 0   ;;  %vm47_vm1 = vcmask 293888   ;;  %s1604_s3 = inlined_call_operand.vmem [shape: f32[32,1], index: 3, kind: input, shape index: {}]   ;;  %s1605_s2 = inlined_call_operand.vmem [shape: f32[32,1], index: 2, kind: input, shape index: {}]   ;;  %s1606_s0 = inlined_call_operand.vmem [shape: f32[36,128], index: 0, kind: input, shape index: {}]   ;;  %s1607_s1 = inlined_call_operand.vmem [shape: f32[32,36], index: 1, kind: input, shape index: {}]   ;;  %s1608_s5 = inlined_call_operand.vmem [shape: f32[32,1], index: 5, kind: input, shape index: {}]   ;;  %s1609_s7 = inlined_call_operand.vmem [shape: f32[32,1], index: 7, kind: input, shape index: {}]   ;;  %s1610_s9 = inlined_call_operand.vmem [shape: f32[64,1], index: 9, kind: input, shape index: {}]   ;;  %s1611_s10 = inlined_call_operand.vmem [shape: f32[64,1], index: 10, kind: input, shape index: {}]   ;;  %s1612_s11 = inlined_call_operand.vmem [shape: f32[352,128], index: 11, kind: output, shape index: {}]   ;;  %s1613_s4 = inlined_call_operand.vmem [shape: f32[32,32], index: 4, kind: input, shape index: {}]   ;;  %s1614_s6 = inlined_call_operand.vmem [shape: f32[32,32], index: 6, kind: input, shape index: {}]   ;;  %s1615_s8 = inlined_call_operand.vmem [shape: f32[64,32], index: 8, kind: input, shape index: {}]  }
   0x1   :  { %984 = vset.pattern.permute.xlu1 %v1066_v0  ;;  %983 = vset.pattern.permute.xlu0 %v1066_v0  ;;  %v128_v1 = vld [vmem:[%s1604_s3 + $0x18] sm:$0xff]  ;;  %v46_v3 = vld [vmem:[%s1606_s0 + $0x20] sm:$0xf]  ;;  %v127_v5 = vld [vmem:[%s1604_s3 + $0x10] sm:$0xff] }
   0x2   :  { %v100_v2 = vld [vmem:[%s1605_s2 + $0x18] sm:$0xff]  ;;  %146 = vperm.xlu1 %984, %v128_v1   ;;  %929 = vmatpush.msk.msra.mxu0 %vm60_vm0, %v46_v3  ;;  %v44_v6 = vld [vmem:[%s1606_s0 + $0x10] sm:$0xff]  ;;  %v43_v7 = vld [vmem:[%s1606_s0 + $0x8] sm:$0xff] }
   0x3   :  { %118 = vperm.xlu0 %983, %v100_v2   ;;  %v45_v4 = vld [vmem:[%s1606_s0 + $0x18] sm:$0xff]  ;;  %985 = vset.pattern.permute.xlu2 %v1066_v0  ;;  %v99_v8 = vld [vmem:[%s1605_s2 + $0x10] sm:$0xff]  ;;  %v98_v9 = vld [vmem:[%s1605_s2 + $0x8] sm:$0xff] }
   0x4   :  { %141 = vperm.xlu2 %985, %v127_v5   ;;  %76 = vmatpush.msra.mxu0 %v45_v4  ;;  %v42_v10 = vld [vmem:[%s1606_s0] sm:$0xff]  ;;  %v126_v13 = vld [vmem:[%s1604_s3 + $0x8] sm:$0xff]  ;;  %v248_v16 = vld [vmem:[%s1608_s5 + $0x18] sm:$0xff] }
   0x5   :  { %v38_v11 = vld [vmem:[%s1607_s1] sm:$0xff]  ;;  %v39_v15 = vld [vmem:[%s1607_s1 + $0x8] sm:$0xff]  ;;  %v247_v17 = vld [vmem:[%s1608_s5 + $0x10] sm:$0xff] }
   0x6   :  { %77 = vmatpush.msra.mxu0 %v44_v6  ;;  %v97_v12 = vld [vmem:[%s1605_s2] sm:$0xff]  ;;  %v246_v18 = vld [vmem:[%s1608_s5 + $0x8] sm:$0xff]  ;;  %v40_v19 = vld [vmem:[%s1607_s1 + $0x10] sm:$0xff] }
   0x7   :  { %v125_v14 = vld [vmem:[%s1604_s3] sm:$0xff]  ;;  %v406_v21 = vld [vmem:[%s1609_s7 + $0x18] sm:$0xff]  ;;  %v405_v22 = vld [vmem:[%s1609_s7 + $0x10] sm:$0xff] }
   0x8   :  { %78 = vmatpush.msra.mxu0 %v43_v7  ;;  %v245_v20 = vld [vmem:[%s1608_s5] sm:$0xff]  ;;  %v41_v23 = vld [vmem:[%s1607_s1 + $0x18] sm:$0xff]  ;;  %v404_v24 = vld [vmem:[%s1609_s7 + $0x8] sm:$0xff] }
   0x9   :  { %v403_v25 = vld [vmem:[%s1609_s7] sm:$0xff]  ;;  %v638_v27 = vld [vmem:[%s1610_s9 + $0x8] sm:$0xff]  ;;  %v639_v28 = vld [vmem:[%s1610_s9 + $0x10] sm:$0xff] }
   0xa   :  { %108 = vperm.xlu1 %984, %v98_v9   ;;  %79 = vmatpush.msra.mxu0 %v42_v10  ;;  %v637_v26 = vld [vmem:[%s1610_s9] sm:$0xff]  ;;  %v640_v29 = vld [vmem:[%s1610_s9 + $0x18] sm:$0xff]  ;;  %v642_v31 = vld [vmem:[%s1610_s9 + $0x28] sm:$0xff] }
   0xb   :  { %113 = vperm.xlu0 %983, %v99_v8   ;;  %930 = vmatmul.msk.f32.vlgmr.msra.gmra.mxu0 %vm47_vm1, %v38_v11  ;;  %v641_v30 = vld [vmem:[%s1610_s9 + $0x20] sm:$0xff]  ;;  %v643_v32 = vld [vmem:[%s1610_s9 + $0x30] sm:$0xff]  ;;  %v644_v33 = vld [vmem:[%s1610_s9 + $0x38] sm:$0xff] }
   0xc   :  { %103 = vperm.xlu2 %985, %v97_v12   ;;  %v693_v34 = vld [vmem:[%s1611_s10] sm:$0xff]  ;;  %v694_v35 = vld [vmem:[%s1611_s10 + $0x8] sm:$0xff]  ;;  %v695_v36 = vld [vmem:[%s1611_s10 + $0x10] sm:$0xff] }
   0xd   :  { %v696_v37 = vld [vmem:[%s1611_s10 + $0x18] sm:$0xff]  ;;  %v697_v38 = vld [vmem:[%s1611_s10 + $0x20] sm:$0xff]  ;;  %v698_v39 = vld [vmem:[%s1611_s10 + $0x28] sm:$0xff] }
   0xe   :  { %v699_v40 = vld [vmem:[%s1611_s10 + $0x30] sm:$0xff]  ;;  %v700_v41 = vld [vmem:[%s1611_s10 + $0x38] sm:$0xff] }
  0x12   :  { %131 = vperm.xlu1 %984, %v125_v14  }
  0x13   :  { %136 = vperm.xlu0 %983, %v126_v13   ;;  %931 = vmatmul.msk.f32.gmra.mxu0 %vm47_vm1, %v39_v15 }
  0x14   :  { %266 = vperm.xlu2 %985, %v248_v16  }
  0x1a   :  { %256 = vperm.xlu1 %984, %v246_v18  }
  0x1b   :  { %261 = vperm.xlu0 %983, %v247_v17   ;;  %932 = vmatmul.msk.f32.gmra.mxu0 %vm47_vm1, %v40_v19 }
  0x1c   :  { %251 = vperm.xlu2 %985, %v245_v20  }
  0x22   :  { %419 = vperm.xlu1 %984, %v405_v22  }
  0x23   :  { %424 = vperm.xlu0 %983, %v406_v21   ;;  %933 = vmatmul.msk.f32.gmra.mxu0 %vm47_vm1, %v41_v23 }
  0x24   :  { %414 = vperm.xlu2 %985, %v404_v24  }
  0x2a   :  { %647 = vperm.xlu1 %984, %v637_v26  }
  0x2b   :  { %409 = vperm.xlu0 %983, %v403_v25  }
  0x2c   :  { %652 = vperm.xlu2 %985, %v638_v27  }
  0x32   :  { %662 = vperm.xlu1 %984, %v640_v29  }
  0x33   :  { %657 = vperm.xlu0 %983, %v639_v28  }
  0x34   :  { %667 = vperm.xlu2 %985, %v641_v30  }
  0x3a   :  { %677 = vperm.xlu1 %984, %v643_v32  }
  0x3b   :  { %672 = vperm.xlu0 %983, %v642_v31  }
  0x3c   :  { %682 = vperm.xlu2 %985, %v644_v33  }
  0x42   :  { %708 = vperm.xlu1 %984, %v694_v35  }
  0x43   :  { %703 = vperm.xlu0 %983, %v693_v34  }
  0x44   :  { %713 = vperm.xlu2 %985, %v695_v36  }
  0x4a   :  { %723 = vperm.xlu1 %984, %v697_v38  }
  0x4b   :  { %718 = vperm.xlu0 %983, %v696_v37  }
  0x4c   :  { %728 = vperm.xlu2 %985, %v698_v39  }
  0x52   :  { %738 = vperm.xlu1 %984, %v700_v41  }
  0x53   :  { %733 = vperm.xlu0 %983, %v699_v40  }
  0x5e   :  { %v142_v43 = vpop.permute.xlu2 %141 }
  0x66   :  { %v104_v46 = vpop.permute.xlu2 %103 }
  0x74   :  { %v147_v42 = vpop.permute.xlu1 %146 }
  0x75   :  { %v119_v44 = vpop.permute.xlu0 %118 }
  0x7c   :  { %v109_v45 = vpop.permute.xlu1 %108 }
  0x7d   :  { %v114_v47 = vpop.permute.xlu0 %113 }
  0x84   :  { %v132_v50 = vpop.permute.xlu1 %131 }
  0x85   :  { %v137_v55 = vpop.permute.xlu0 %136 }
  0x88   :  { %v81_v48 = vpop.f32.mrf.mxu0 }
  0x89   :  { %93 = vst [vmem:[%s1612_s11] sm:$0xff] %v81_v48  ;;  %v121_v49 = vmul.f32 %v104_v46, %v81_v48 }
  0x8b   :  { %v149_v51 = vadd.f32 %v132_v50, %v121_v49 }
  0x8d   :  { %153 = vst [vmem:[%s1612_s11 + $0x20] sm:$0xff] %v149_v51  ;;  %v934_v52 = vmul.f32 -1.442695, %v149_v51 }
  0x8f   :  { %986 = vpow2.f32 %v934_v52 }
  0x90   :  { %v84_v53 = vpop.f32.mrf.mxu0 }
  0x91   :  { %94 = vst [vmem:[%s1612_s11 + $0x8] sm:$0xff] %v84_v53  ;;  %v122_v54 = vmul.f32 %v109_v45, %v84_v53 }
  0x93   :  { %v150_v56 = vadd.f32 %v137_v55, %v122_v54  ;;  %v241_v54 = vld [vmem:[%s1613_s4] sm:$0xff]  ;;  %v242_v55 = vld [vmem:[%s1613_s4 + $0x8] sm:$0xff] }
  0x95   :  { %v987_v57 = vpop.eup %986  ;;  %154 = vst [vmem:[%s1612_s11 + $0x28] sm:$0xff] %v150_v56  ;;  %v935_v58 = vmul.f32 -1.442695, %v150_v56 }
  0x96   :  { %v169_v59 = vadd.f32 1.0, %v987_v57  ;;  %v243_v57 = vld [vmem:[%s1613_s4 + $0x10] sm:$0xff] }
  0x97   :  { %988 = vpow2.f32 %v935_v58  ;;  %v267_v58 = vpop.permute.xlu2 %266 }
  0x98   :  { %990 = vrcp.f32 %v169_v59  ;;  %v87_v60 = vpop.f32.mrf.mxu0  ;;  %v184_v7 = vand.u32 2147483648, %v169_v59  ;;  %v182_v9 = vand.u32 2147483647, %v169_v59  ;;  %vm178_vm3 = vweird.f32 %v169_v59 }
  0x99   :  { %95 = vst [vmem:[%s1612_s11 + $0x10] sm:$0xff] %v87_v60  ;;  %v123_v61 = vmul.f32 %v114_v47, %v87_v60 }
  0x9a   :  { %v185_v15 = vor.u32 1.1754944e-38, %v184_v7  ;;  %vm183_vm5 = vcmp.eq.f32.partialorder %v182_v9, 8.507059e+37 }
  0x9b   :  { %v1269_v62 = vadd.f32 %v142_v43, %v123_v61  ;;  %v257_v61 = vpop.permute.xlu1 %256 }
  0x9d   :  { %v989_v63 = vpop.eup %988  ;;  %155 = vst [vmem:[%s1612_s11 + $0x30] sm:$0xff] %v1269_v62  ;;  %v936_v0 = vmul.f32 -1.442695, %v1269_v62 }
  0x9e   :  { %v991_v1 = vpop.eup %990  ;;  %v170_v2 = vadd.f32 1.0, %v989_v63 }
  0x9f   :  { %v174_v3 = vmul.f32 %v991_v1, %v169_v59  ;;  %992 = vpow2.f32 %v936_v0  ;;  %vm179_vm2 = vweird.f32 %v991_v1  ;;  %v252_v59 = vpop.permute.xlu2 %251 }
  0xa0   :  { %994 = vrcp.f32 %v170_v2  ;;  %v90_v4 = vpop.f32.mrf.mxu0  ;;  %vm180_vm4 = vmor %vm178_vm3, %vm179_vm2  ;;  %v199_v22 = vand.u32 2147483648, %v170_v2  ;;  %v197_v24 = vand.u32 2147483647, %v170_v2  ;;  %vm193_vm7 = vweird.f32 %v170_v2 }
  0xa1   :  { %v175_v5 = vsub.f32 1.0, %v174_v3  ;;  %96 = vst [vmem:[%s1612_s11 + $0x18] sm:$0xff] %v90_v4  ;;  %v124_v6 = vmul.f32 %v119_v44, %v90_v4  ;;  %vm269_vm2 = vcmask 261120  }
  0xa2   :  { %v200_v28 = vor.u32 1.1754944e-38, %v199_v22  ;;  %vm198_vm9 = vcmp.eq.f32.partialorder %v197_v24, 8.507059e+37 }
  0xa3   :  { %v176_v8 = vmul.f32 %v991_v1, %v175_v5  ;;  %v1279_v10 = vadd.f32 %v147_v42, %v124_v6  ;;  %v262_v5 = vpop.permute.xlu0 %261 }
  0xa5   :  { %v993_v11 = vpop.eup %992  ;;  %v177_v12 = vadd.f32 %v991_v1, %v176_v8  ;;  %156 = vst [vmem:[%s1612_s11 + $0x38] sm:$0xff] %v1279_v10  ;;  %v937_v13 = vmul.f32 -1.442695, %v1279_v10 }
  0xa6   :  { %v995_v14 = vpop.eup %994  ;;  %v171_v16 = vadd.f32 1.0, %v993_v11 }
  0xa7   :  { %v181_v17 = vsel %vm180_vm4, %v991_v1, %v177_v12  ;;  %v189_v18 = vmul.f32 %v995_v14, %v170_v2  ;;  %996 = vpow2.f32 %v937_v13  ;;  %vm194_vm6 = vweird.f32 %v995_v14 }
  0xa8   :  { %v186_v19 = vsel %vm183_vm5, %v185_v15, %v181_v17  ;;  %998 = vrcp.f32 %v171_v16  ;;  %vm195_vm8 = vmor %vm193_vm7, %vm194_vm6  ;;  %v214_v35 = vand.u32 2147483648, %v171_v16  ;;  %v212_v37 = vand.u32 2147483647, %v171_v16 }
  0xa9   :  { %v1286_v20 = vmul.f32 %v186_v19, %v149_v51  ;;  %v190_v21 = vsub.f32 1.0, %v189_v18  ;;  %vm208_vm11 = vweird.f32 %v171_v16 }
  0xaa   :  { %v215_v40 = vor.u32 1.1754944e-38, %v214_v35  ;;  %vm213_vm13 = vcmp.eq.f32.partialorder %v212_v37, 8.507059e+37 }
  0xab   :  { %237 = vst [vmem:[%s1612_s11 + $0x40] sm:$0xff] %v1286_v20  ;;  %v191_v23 = vmul.f32 %v995_v14, %v190_v21 }
  0xad   :  { %v997_v25 = vpop.eup %996  ;;  %v192_v26 = vadd.f32 %v995_v14, %v191_v23 }
  0xae   :  { %v999_v27 = vpop.eup %998  ;;  %v172_v29 = vadd.f32 1.0, %v997_v25 }
  0xaf   :  { %v196_v30 = vsel %vm195_vm8, %v995_v14, %v192_v26  ;;  %v204_v31 = vmul.f32 %v999_v27, %v171_v16  ;;  %vm209_vm10 = vweird.f32 %v999_v27 }
  0xb0   :  { %v201_v32 = vsel %vm198_vm9, %v200_v28, %v196_v30  ;;  %1000 = vrcp.f32 %v172_v29  ;;  %vm210_vm12 = vmor %vm208_vm11, %vm209_vm10  ;;  %v229_v46 = vand.u32 2147483648, %v172_v29  ;;  %v227_v48 = vand.u32 2147483647, %v172_v29 }
  0xb1   :  { %v1292_v33 = vmul.f32 %v201_v32, %v150_v56  ;;  %v205_v34 = vsub.f32 1.0, %v204_v31  ;;  %vm223_vm15 = vweird.f32 %v172_v29  ;;  %v244_v56 = vld [vmem:[%s1613_s4 + $0x18] sm:$0xff] }
  0xb2   :  { %v230_v50 = vor.u32 1.1754944e-38, %v229_v46  ;;  %vm228_vm1 = vcmp.eq.f32.partialorder %v227_v48, 8.507059e+37 }
  0xb3   :  { %238 = vst [vmem:[%s1612_s11 + $0x48] sm:$0xff] %v1292_v33  ;;  %v206_v36 = vmul.f32 %v999_v27, %v205_v34 }
  0xb5   :  { %v207_v38 = vadd.f32 %v999_v27, %v206_v36 }
  0xb6   :  { %v1001_v39 = vpop.eup %1000 }
  0xb7   :  { %v211_v41 = vsel %vm210_vm12, %v999_v27, %v207_v38  ;;  %v219_v42 = vmul.f32 %v1001_v39, %v172_v29  ;;  %vm224_vm14 = vweird.f32 %v1001_v39 }
  0xb8   :  { %v216_v43 = vsel %vm213_vm13, %v215_v40, %v211_v41  ;;  %vm225_vm0 = vmor %vm223_vm15, %vm224_vm14 }
  0xb9   :  { %v1299_v44 = vmul.f32 %v216_v43, %v1269_v62  ;;  %v220_v45 = vsub.f32 1.0, %v219_v42 }
  0xbb   :  { %239 = vst [vmem:[%s1612_s11 + $0x50] sm:$0xff] %v1299_v44  ;;  %v221_v47 = vmul.f32 %v1001_v39, %v220_v45 }
  0xbd   :  { %v222_v49 = vadd.f32 %v1001_v39, %v221_v47 }
  0xbf   :  { %v226_v51 = vsel %vm225_vm0, %v1001_v39, %v222_v49 }
  0xc0   :  { %v231_v52 = vsel %vm228_vm1, %v230_v50, %v226_v51 }
  0xc1   :  { %v1306_v53 = vmul.f32 %v231_v52, %v1279_v10 }
  0xc3   :  { %240 = vst [vmem:[%s1612_s11 + $0x58] sm:$0xff] %v1306_v53  ;;  %294 = vmatpush.msrb.mxu0 %v1306_v53  ;;  %970 = vmatpush.msra.mxu1 %v1306_v53 }
  0xc4   :  { %971 = vmatpush.msra.mxu2 %v1306_v53 }
  0xc5   :  { %295 = vmatpush.msrb.mxu0 %v1299_v44  ;;  %972 = vmatpush.msra.mxu1 %v1299_v44 }
  0xc6   :  { %973 = vmatpush.msra.mxu2 %v1299_v44 }
  0xc7   :  { %296 = vmatpush.msrb.mxu0 %v1292_v33  ;;  %974 = vmatpush.msra.mxu1 %v1292_v33 }
  0xc8   :  { %975 = vmatpush.msra.mxu2 %v1292_v33 }
  0xc9   :  { %297 = vmatpush.msrb.mxu0 %v1286_v20  ;;  %976 = vmatpush.msra.mxu1 %v1286_v20 }
  0xca   :  { %977 = vmatpush.msra.mxu2 %v1286_v20  ;;  %938 = vmatmul.msk.f32.vlgmr.msrb.gmra.mxu0 %vm269_vm2, %v241_v54 }
  0xcb   :  { %939 = vmatmul.msk.f32.vlgmr.msra.gmra.mxu1 %vm269_vm2, %v242_v55  ;;  %941 = vmatmul.msk.f32.vlgmr.msra.gmra.mxu2 %vm269_vm2, %v244_v56 }
  0xd3   :  { %940 = vmatmul.msk.f32.gmra.mxu1 %vm269_vm2, %v243_v57 }
 0x147   :  { %v299_v60 = vpop.f32.mrf.mxu0 }
 0x148   :  { %v300_v62 = vadd.f32 %v299_v60, %v252_v59  ;;  %v302_v63 = vpop.f32.mrf.mxu1 }
 0x149   :  { %v303_v0 = vadd.f32 %v302_v63, %v257_v61 }
 0x14a   :  { %v942_v1 = vmul.f32 -1.442695, %v300_v62 }
 0x14b   :  { %v943_v2 = vmul.f32 -1.442695, %v303_v0 }
 0x14c   :  { %1002 = vpow2.f32 %v942_v1 }
 0x14d   :  { %1004 = vpow2.f32 %v943_v2 }
 0x14e   :  { %v308_v3 = vpop.f32.mrf.mxu2 }
 0x14f   :  { %v1340_v4 = vadd.f32 %v308_v3, %v267_v58 }
 0x150   :  { %v305_v6 = vpop.f32.mrf.mxu1 }
 0x151   :  { %v945_v7 = vmul.f32 -1.442695, %v1340_v4  ;;  %v1343_v8 = vadd.f32 %v305_v6, %v262_v5  ;;  %v402_v5 = vld [vmem:[%s1614_s6 + $0x18] sm:$0xff]  ;;  %v425_v6 = vpop.permute.xlu0 %424 }
 0x152   :  { %v1003_v9 = vpop.eup %1002 }
 0x153   :  { %v1005_v10 = vpop.eup %1004  ;;  %v323_v11 = vadd.f32 1.0, %v1003_v9  ;;  %1006 = vpow2.f32 %v945_v7  ;;  %v944_v12 = vmul.f32 -1.442695, %v1343_v8 }
 0x154   :  { %v324_v13 = vadd.f32 1.0, %v1005_v10 }
 0x155   :  { %1008 = vrcp.f32 %v323_v11  ;;  %v336_v24 = vand.u32 2147483647, %v323_v11  ;;  %v338_v25 = vand.u32 2147483648, %v323_v11  ;;  %vm332_vm5 = vweird.f32 %v323_v11 }
 0x156   :  { %1010 = vrcp.f32 %v324_v13  ;;  %v353_v28 = vand.u32 2147483648, %v324_v13  ;;  %v351_v30 = vand.u32 2147483647, %v324_v13  ;;  %vm347_vm7 = vweird.f32 %v324_v13 }
 0x157   :  { %1012 = vpow2.f32 %v944_v12  ;;  %v339_v34 = vor.u32 1.1754944e-38, %v338_v25  ;;  %vm337_vm8 = vcmp.eq.f32.partialorder %v336_v24, 8.507059e+37 }
 0x158   :  { %v354_v38 = vor.u32 1.1754944e-38, %v353_v28  ;;  %vm352_vm10 = vcmp.eq.f32.partialorder %v351_v30, 8.507059e+37 }
 0x159   :  { %v1007_v14 = vpop.eup %1006  ;;  %v410_v7 = vpop.permute.xlu0 %409 }
 0x15a   :  { %v326_v15 = vadd.f32 1.0, %v1007_v14 }
 0x15b   :  { %v1009_v16 = vpop.eup %1008 }
 0x15c   :  { %v1011_v17 = vpop.eup %1010  ;;  %v328_v18 = vmul.f32 %v1009_v16, %v323_v11  ;;  %1014 = vrcp.f32 %v326_v15  ;;  %vm333_vm3 = vweird.f32 %v1009_v16  ;;  %v381_v46 = vand.u32 2147483647, %v326_v15  ;;  %v415_v11 = vpop.permute.xlu2 %414 }
 0x15d   :  { %v1013_v19 = vpop.eup %1012  ;;  %v343_v21 = vmul.f32 %v1011_v17, %v324_v13  ;;  %vm348_vm4 = vweird.f32 %v1011_v17  ;;  %vm334_vm6 = vmor %vm332_vm5, %vm333_vm3  ;;  %v383_v47 = vand.u32 2147483648, %v326_v15  ;;  %vm377_vm12 = vweird.f32 %v326_v15 }
 0x15e   :  { %v329_v22 = vsub.f32 1.0, %v328_v18  ;;  %v325_v23 = vadd.f32 1.0, %v1013_v19  ;;  %vm349_vm9 = vmor %vm347_vm7, %vm348_vm4  ;;  %vm382_vm14 = vcmp.eq.f32.partialorder %v381_v46, 8.507059e+37 }
 0x15f   :  { %v344_v26 = vsub.f32 1.0, %v343_v21  ;;  %v384_v56 = vor.u32 1.1754944e-38, %v383_v47 }
 0x160   :  { %v330_v27 = vmul.f32 %v1009_v16, %v329_v22  ;;  %1016 = vrcp.f32 %v325_v23  ;;  %v368_v57 = vand.u32 2147483648, %v325_v23  ;;  %vm362_vm0 = vweird.f32 %v325_v23 }
 0x161   :  { %v345_v29 = vmul.f32 %v1011_v17, %v344_v26 }
 0x162   :  { %v1015_v31 = vpop.eup %1014  ;;  %v331_v32 = vadd.f32 %v1009_v16, %v330_v27 }
 0x163   :  { %v346_v35 = vadd.f32 %v1011_v17, %v345_v29  ;;  %v373_v36 = vmul.f32 %v1015_v31, %v326_v15  ;;  %vm378_vm11 = vweird.f32 %v1015_v31 }
 0x164   :  { %v335_v37 = vsel %vm334_vm6, %v1009_v16, %v331_v32  ;;  %vm379_vm13 = vmor %vm377_vm12, %vm378_vm11 }
 0x165   :  { %v340_v39 = vsel %vm337_vm8, %v339_v34, %v335_v37  ;;  %v350_v40 = vsel %vm349_vm9, %v1011_v17, %v346_v35  ;;  %v374_v41 = vsub.f32 1.0, %v373_v36  ;;  %v420_v17 = vpop.permute.xlu1 %419 }
 0x166   :  { %v1017_v42 = vpop.eup %1016  ;;  %v387_v43 = vmul.f32 %v340_v39, %v300_v62  ;;  %v355_v45 = vsel %vm352_vm10, %v354_v38, %v350_v40  ;;  %v369_v62 = vor.u32 1.1754944e-38, %v368_v57 }
 0x167   :  { %v388_v48 = vmul.f32 %v355_v45, %v303_v0  ;;  %v375_v49 = vmul.f32 %v1015_v31, %v374_v41  ;;  %v358_v50 = vmul.f32 %v1017_v42, %v325_v23  ;;  %vm363_vm15 = vweird.f32 %v1017_v42 }
 0x168   :  { %v1347_v51 = vadd.f32 %v387_v43, %v1286_v20  ;;  %v366_v20 = vand.u32 2147483647, %v325_v23  ;;  %vm364_vm1 = vmor %vm362_vm0, %vm363_vm15 }
 0x169   :  { %v376_v52 = vadd.f32 %v1015_v31, %v375_v49  ;;  %v359_v54 = vsub.f32 1.0, %v358_v50  ;;  %v1350_v55 = vadd.f32 %v388_v48, %v1292_v33 }
 0x16a   :  { %395 = vst [vmem:[%s1612_s11 + $0x60] sm:$0xff] %v1347_v51  ;;  %vm367_vm3 = vcmp.eq.f32.partialorder %v366_v20, 8.507059e+37 }
 0x16b   :  { %v380_v58 = vsel %vm379_vm13, %v1015_v31, %v376_v52  ;;  %v360_v59 = vmul.f32 %v1017_v42, %v359_v54  ;;  %396 = vst [vmem:[%s1612_s11 + $0x68] sm:$0xff] %v1350_v55 }
 0x16c   :  { %v385_v33 = vsel %vm382_vm14, %v384_v56, %v380_v58 }
 0x16d   :  { %v390_v60 = vmul.f32 %v385_v33, %v1340_v4  ;;  %v361_v61 = vadd.f32 %v1017_v42, %v360_v59  ;;  %v401_v4 = vld [vmem:[%s1614_s6 + $0x10] sm:$0xff] }
 0x16f   :  { %v365_v63 = vsel %vm364_vm1, %v1017_v42, %v361_v61  ;;  %v1362_v0 = vadd.f32 %v390_v60, %v1306_v53  ;;  %v399_v53 = vld [vmem:[%s1614_s6] sm:$0xff] }
 0x170   :  { %v370_v1 = vsel %vm367_vm3, %v369_v62, %v365_v63 }
 0x171   :  { %v389_v2 = vmul.f32 %v370_v1, %v1343_v8  ;;  %398 = vst [vmem:[%s1612_s11 + $0x78] sm:$0xff] %v1362_v0  ;;  %451 = vmatpush.msrb.mxu2 %v1362_v0 }
 0x173   :  { %v1371_v3 = vadd.f32 %v389_v2, %v1299_v44  ;;  %v400_v44 = vld [vmem:[%s1614_s6 + $0x8] sm:$0xff] }
 0x175   :  { %397 = vst [vmem:[%s1612_s11 + $0x70] sm:$0xff] %v1371_v3  ;;  %452 = vmatpush.msrb.mxu2 %v1371_v3 }
 0x177   :  { %453 = vmatpush.msrb.mxu2 %v1350_v55 }
 0x179   :  { %454 = vmatpush.msrb.mxu2 %v1347_v51 }
 0x17a   :  { %946 = vmatmul.msk.f32.vlgmr.msrb.gmra.mxu2 %vm269_vm2, %v399_v53 }
 0x182   :  { %947 = vmatmul.msk.f32.gmra.mxu2 %vm269_vm2, %v400_v44 }
 0x18a   :  { %948 = vmatmul.msk.f32.gmra.mxu2 %vm269_vm2, %v401_v4 }
 0x192   :  { %949 = vmatmul.msk.f32.gmra.mxu2 %vm269_vm2, %v402_v5 }
 0x1fd   :  { %v456_v8 = vpop.f32.mrf.mxu2 }
 0x1fe   :  { %v457_v9 = vadd.f32 %v456_v8, %v410_v7 }
 0x200   :  { %v950_v10 = vmul.f32 -1.442695, %v457_v9 }
 0x202   :  { %1018 = vpow2.f32 %v950_v10 }
 0x205   :  { %v459_v12 = vpop.f32.mrf.mxu2 }
 0x206   :  { %v460_v13 = vadd.f32 %v459_v12, %v415_v11 }
 0x208   :  { %v1019_v14 = vpop.eup %1018  ;;  %v951_v15 = vmul.f32 -1.442695, %v460_v13 }
 0x209   :  { %v480_v16 = vadd.f32 1.0, %v1019_v14 }
 0x20a   :  { %1020 = vpow2.f32 %v951_v15 }
 0x20b   :  { %1022 = vrcp.f32 %v480_v16  ;;  %v495_v27 = vand.u32 2147483648, %v480_v16  ;;  %v493_v30 = vand.u32 2147483647, %v480_v16  ;;  %vm489_vm5 = vweird.f32 %v480_v16 }
 0x20d   :  { %v462_v18 = vpop.f32.mrf.mxu2  ;;  %v496_v37 = vor.u32 1.1754944e-38, %v495_v27  ;;  %vm494_vm7 = vcmp.eq.f32.partialorder %v493_v30, 8.507059e+37 }
 0x20e   :  { %v1396_v19 = vadd.f32 %v462_v18, %v420_v17  ;;  %v560_v17 = vld [vmem:[%s1615_s8 + $0x20] sm:$0xff]  ;;  %v558_v18 = vld [vmem:[%s1615_s8 + $0x10] sm:$0xff] }
 0x210   :  { %v1021_v21 = vpop.eup %1020  ;;  %v952_v22 = vmul.f32 -1.442695, %v1396_v19 }
 0x211   :  { %v1023_v23 = vpop.eup %1022  ;;  %v481_v24 = vadd.f32 1.0, %v1021_v21  ;;  %v562_v21 = vld [vmem:[%s1615_s8 + $0x30] sm:$0xff] }
 0x212   :  { %v485_v25 = vmul.f32 %v1023_v23, %v480_v16  ;;  %1024 = vpow2.f32 %v952_v22  ;;  %vm490_vm4 = vweird.f32 %v1023_v23  ;;  %v559_v16 = vld [vmem:[%s1615_s8 + $0x18] sm:$0xff] }
 0x213   :  { %1026 = vrcp.f32 %v481_v24  ;;  %vm491_vm6 = vmor %vm489_vm5, %vm490_vm4  ;;  %v510_v45 = vand.u32 2147483648, %v481_v24  ;;  %v508_v47 = vand.u32 2147483647, %v481_v24  ;;  %vm504_vm9 = vweird.f32 %v481_v24  ;;  %v563_v22 = vld [vmem:[%s1615_s8 + $0x38] sm:$0xff] }
 0x214   :  { %v486_v26 = vsub.f32 1.0, %v485_v25  ;;  %v653_v25 = vpop.permute.xlu2 %652 }
 0x215   :  { %v465_v28 = vpop.f32.mrf.mxu2  ;;  %v511_v54 = vor.u32 1.1754944e-38, %v510_v45  ;;  %vm509_vm11 = vcmp.eq.f32.partialorder %v508_v47, 8.507059e+37 }
 0x216   :  { %v487_v29 = vmul.f32 %v1023_v23, %v486_v26  ;;  %v1399_v31 = vadd.f32 %v465_v28, %v425_v6 }
 0x218   :  { %v1025_v32 = vpop.eup %1024  ;;  %v488_v34 = vadd.f32 %v1023_v23, %v487_v29  ;;  %v953_v35 = vmul.f32 -1.442695, %v1399_v31 }
 0x219   :  { %v1027_v36 = vpop.eup %1026  ;;  %v482_v38 = vadd.f32 1.0, %v1025_v32 }
 0x21a   :  { %v492_v39 = vsel %vm491_vm6, %v1023_v23, %v488_v34  ;;  %v500_v40 = vmul.f32 %v1027_v36, %v481_v24  ;;  %1028 = vpow2.f32 %v953_v35  ;;  %vm505_vm8 = vweird.f32 %v1027_v36  ;;  %v648_v23 = vpop.permute.xlu1 %647  ;;  %v658_v24 = vpop.permute.xlu0 %657 }
 0x21b   :  { %v497_v41 = vsel %vm494_vm7, %v496_v37, %v492_v39  ;;  %1030 = vrcp.f32 %v482_v38  ;;  %vm506_vm10 = vmor %vm504_vm9, %vm505_vm8  ;;  %v525_v60 = vand.u32 2147483648, %v482_v38  ;;  %v523_v61 = vand.u32 2147483647, %v482_v38 }
 0x21c   :  { %v544_v42 = vmul.f32 %v497_v41, %v457_v9  ;;  %v501_v43 = vsub.f32 1.0, %v500_v40  ;;  %vm519_vm13 = vweird.f32 %v482_v38  ;;  %v668_v28 = vpop.permute.xlu2 %667 }
 0x21d   :  { %v526_v2 = vor.u32 1.1754944e-38, %v525_v60  ;;  %vm524_vm15 = vcmp.eq.f32.partialorder %v523_v61, 8.507059e+37 }
 0x21e   :  { %v502_v46 = vmul.f32 %v1027_v36, %v501_v43  ;;  %v548_v48 = vadd.f32 %v544_v42, %v1347_v51 }
 0x220   :  { %v1029_v49 = vpop.eup %1028  ;;  %v503_v50 = vadd.f32 %v1027_v36, %v502_v46  ;;  %552 = vst [vmem:[%s1612_s11 + $0x80] sm:$0xff] %v548_v48 }
 0x221   :  { %v1031_v52 = vpop.eup %1030  ;;  %v483_v56 = vadd.f32 1.0, %v1029_v49 }
 0x222   :  { %v507_v57 = vsel %vm506_vm10, %v1027_v36, %v503_v50  ;;  %v515_v58 = vmul.f32 %v1031_v52, %v482_v38  ;;  %vm520_vm12 = vweird.f32 %v1031_v52  ;;  %v663_v26 = vpop.permute.xlu1 %662  ;;  %v673_v27 = vpop.permute.xlu0 %672 }
 0x223   :  { %v512_v59 = vsel %vm509_vm11, %v511_v54, %v507_v57  ;;  %1032 = vrcp.f32 %v483_v56  ;;  %vm521_vm14 = vmor %vm519_vm13, %vm520_vm12  ;;  %v540_v7 = vand.u32 2147483648, %v483_v56  ;;  %vm534_vm1 = vweird.f32 %v483_v56 }
 0x224   :  { %v545_v20 = vmul.f32 %v512_v59, %v460_v13  ;;  %v516_v33 = vsub.f32 1.0, %v515_v58  ;;  %v1459_v35 = vpop.permute.xlu2 %682 }
 0x225   :  { %v541_v11 = vor.u32 1.1754944e-38, %v540_v7 }
 0x226   :  { %v517_v51 = vmul.f32 %v1031_v52, %v516_v33  ;;  %v549_v62 = vadd.f32 %v545_v20, %v1350_v55  ;;  %v538_v55 = vand.u32 2147483647, %v483_v56 }
 0x228   :  { %v518_v63 = vadd.f32 %v1031_v52, %v517_v51  ;;  %553 = vst [vmem:[%s1612_s11 + $0x88] sm:$0xff] %v549_v62  ;;  %vm539_vm4 = vcmp.eq.f32.partialorder %v538_v55, 8.507059e+37 }
 0x229   :  { %v1033_v1 = vpop.eup %1032 }
 0x22a   :  { %v522_v53 = vsel %vm521_vm14, %v1031_v52, %v518_v63  ;;  %v530_v44 = vmul.f32 %v1033_v1, %v483_v56  ;;  %vm535_vm0 = vweird.f32 %v1033_v1  ;;  %v1452_v29 = vpop.permute.xlu1 %677  ;;  %v704_v30 = vpop.permute.xlu0 %703 }
 0x22b   :  { %v527_v4 = vsel %vm524_vm15, %v526_v2, %v522_v53  ;;  %vm536_vm3 = vmor %vm534_vm1, %vm535_vm0 }
 0x22c   :  { %v546_v5 = vmul.f32 %v527_v4, %v1396_v19  ;;  %v531_v6 = vsub.f32 1.0, %v530_v44  ;;  %v561_v19 = vld [vmem:[%s1615_s8 + $0x28] sm:$0xff]  ;;  %v714_v52 = vpop.permute.xlu2 %713 }
 0x22e   :  { %v532_v8 = vmul.f32 %v1033_v1, %v531_v6  ;;  %v550_v9 = vadd.f32 %v546_v5, %v1371_v3  ;;  %v556_v3 = vld [vmem:[%s1615_s8] sm:$0xff] }
 0x230   :  { %v533_v10 = vadd.f32 %v1033_v1, %v532_v8  ;;  %554 = vst [vmem:[%s1612_s11 + $0x90] sm:$0xff] %v550_v9 }
 0x232   :  { %v537_v12 = vsel %vm536_vm3, %v1033_v1, %v533_v10  ;;  %v709_v37 = vpop.permute.xlu1 %708  ;;  %v719_v40 = vpop.permute.xlu0 %718 }
 0x233   :  { %v542_v13 = vsel %vm539_vm4, %v541_v11, %v537_v12 }
 0x234   :  { %v547_v14 = vmul.f32 %v542_v13, %v1399_v31  ;;  %v729_v4 = vpop.permute.xlu2 %728 }
 0x236   :  { %v551_v15 = vadd.f32 %v547_v14, %v1362_v0  ;;  %v557_v0 = vld [vmem:[%s1615_s8 + $0x8] sm:$0xff] }
 0x238   :  { %555 = vst [vmem:[%s1612_s11 + $0x98] sm:$0xff] %v551_v15  ;;  %600 = vmatpush.msrb.mxu1 %v551_v15  ;;  %978 = vmatpush.msra.mxu3 %v551_v15 }
 0x23a   :  { %601 = vmatpush.msrb.mxu1 %v550_v9  ;;  %979 = vmatpush.msra.mxu3 %v550_v9  ;;  %v724_v56 = vpop.permute.xlu1 %723 }
 0x23c   :  { %602 = vmatpush.msrb.mxu1 %v549_v62  ;;  %980 = vmatpush.msra.mxu3 %v549_v62 }
 0x23e   :  { %603 = vmatpush.msrb.mxu1 %v548_v48  ;;  %981 = vmatpush.msra.mxu3 %v548_v48 }
 0x23f   :  { %954 = vmatmul.msk.f32.vlgmr.msrb.gmra.mxu1 %vm269_vm2, %v556_v3  ;;  %957 = vmatmul.msk.f32.vlgmr.msra.gmra.mxu3 %vm269_vm2, %v559_v16 }
 0x247   :  { %955 = vmatmul.msk.f32.gmra.mxu1 %vm269_vm2, %v557_v0  ;;  %958 = vmatmul.msk.f32.gmra.mxu3 %vm269_vm2, %v560_v17 }
 0x24f   :  { %956 = vmatmul.msk.f32.gmra.mxu1 %vm269_vm2, %v558_v18  ;;  %959 = vmatmul.msk.f32.gmra.mxu3 %vm269_vm2, %v561_v19 }
 0x257   :  { %960 = vmatmul.msk.f32.gmra.mxu3 %vm269_vm2, %v562_v21 }
 0x25f   :  { %961 = vmatmul.msk.f32.gmra.mxu3 %vm269_vm2, %v563_v22 }
 0x2bc   :  { %v605_v31 = vpop.f32.mrf.mxu1 }
 0x2bd   :  { %629 = vst [vmem:[%s1612_s11 + $0xa0] sm:$0xff] %v605_v31  ;;  %v685_v32 = vmul.f32 %v648_v23, %v605_v31 }
 0x2bf   :  { %v1457_v34 = vadd.f32 %v704_v30, %v685_v32 }
 0x2c1   :  { %749 = vst [vmem:[%s1612_s11 + $0xe0] sm:$0xff] %v1457_v34  ;;  %v962_v36 = vmul.f32 -1.442695, %v1457_v34 }
 0x2c2   :  { %v614_v38 = vpop.f32.mrf.mxu3 }
 0x2c3   :  { %1034 = vpow2.f32 %v962_v36  ;;  %632 = vst [vmem:[%s1612_s11 + $0xb8] sm:$0xff] %v614_v38  ;;  %v688_v39 = vmul.f32 %v663_v26, %v614_v38 }
 0x2c4   :  { %v608_v41 = vpop.f32.mrf.mxu1 }
 0x2c5   :  { %v1469_v42 = vadd.f32 %v719_v40, %v688_v39  ;;  %630 = vst [vmem:[%s1612_s11 + $0xa8] sm:$0xff] %v608_v41  ;;  %v686_v43 = vmul.f32 %v653_v25, %v608_v41 }
 0x2c7   :  { %752 = vst [vmem:[%s1612_s11 + $0xf8] sm:$0xff] %v1469_v42  ;;  %v965_v45 = vmul.f32 -1.442695, %v1469_v42  ;;  %v1479_v46 = vadd.f32 %v709_v37, %v686_v43  ;;  %v734_v37 = vpop.permute.xlu0 %733 }
 0x2c9   :  { %v1035_v47 = vpop.eup %1034  ;;  %1036 = vpow2.f32 %v965_v45  ;;  %750 = vst [vmem:[%s1612_s11 + $0xe8] sm:$0xff] %v1479_v46  ;;  %v963_v48 = vmul.f32 -1.442695, %v1479_v46 }
 0x2ca   :  { %v781_v49 = vadd.f32 1.0, %v1035_v47  ;;  %v617_v50 = vpop.f32.mrf.mxu3 }
 0x2cb   :  { %1038 = vpow2.f32 %v963_v48  ;;  %633 = vst [vmem:[%s1612_s11 + $0xc0] sm:$0xff] %v617_v50  ;;  %v689_v54 = vmul.f32 %v668_v28, %v617_v50 }
 0x2cc   :  { %1040 = vrcp.f32 %v781_v49  ;;  %v611_v57 = vpop.f32.mrf.mxu1  ;;  %v798_v6 = vand.u32 2147483647, %v781_v49  ;;  %v800_v7 = vand.u32 2147483648, %v781_v49  ;;  %vm794_vm5 = vweird.f32 %v781_v49 }
 0x2cd   :  { %v1489_v58 = vadd.f32 %v724_v56, %v689_v54  ;;  %631 = vst [vmem:[%s1612_s11 + $0xb0] sm:$0xff] %v611_v57  ;;  %v687_v59 = vmul.f32 %v658_v24, %v611_v57 }
 0x2ce   :  { %vm799_vm7 = vcmp.eq.f32.partialorder %v798_v6, 8.507059e+37  ;;  %v801_v3 = vor.u32 1.1754944e-38, %v800_v7 }
 0x2cf   :  { %v1037_v20 = vpop.eup %1036  ;;  %753 = vst [vmem:[%s1612_s11 + $0x100] sm:$0xff] %v1489_v58  ;;  %v966_v33 = vmul.f32 -1.442695, %v1489_v58  ;;  %v1499_v60 = vadd.f32 %v714_v52, %v687_v59 }
 0x2d0   :  { %v784_v51 = vadd.f32 1.0, %v1037_v20 }
 0x2d1   :  { %v1039_v61 = vpop.eup %1038  ;;  %1042 = vpow2.f32 %v966_v33  ;;  %751 = vst [vmem:[%s1612_s11 + $0xf0] sm:$0xff] %v1499_v60  ;;  %v964_v62 = vmul.f32 -1.442695, %v1499_v60 }
 0x2d2   :  { %v1041_v63 = vpop.eup %1040  ;;  %1044 = vrcp.f32 %v784_v51  ;;  %v620_v1 = vpop.f32.mrf.mxu3  ;;  %v1506_v53 = vadd.f32 1.0, %v1039_v61  ;;  %v843_v16 = vand.u32 2147483647, %v784_v51  ;;  %v845_v23 = vand.u32 2147483648, %v784_v51 }
 0x2d3   :  { %v790_v2 = vmul.f32 %v1041_v63, %v781_v49  ;;  %1046 = vpow2.f32 %v964_v62  ;;  %634 = vst [vmem:[%s1612_s11 + $0xc8] sm:$0xff] %v620_v1  ;;  %v690_v44 = vmul.f32 %v673_v27, %v620_v1  ;;  %vm795_vm2 = vweird.f32 %v1041_v63  ;;  %v739_v62 = vpop.permute.xlu1 %738 }
 0x2d4   :  { %1048 = vrcp.f32 %v1506_v53  ;;  %vm796_vm6 = vmor %vm794_vm5, %vm795_vm2  ;;  %v813_v25 = vand.u32 2147483647, %v1506_v53  ;;  %v815_v30 = vand.u32 2147483648, %v1506_v53  ;;  %vm839_vm9 = vweird.f32 %v784_v51 }
 0x2d5   :  { %v791_v5 = vsub.f32 1.0, %v790_v2  ;;  %v1512_v8 = vadd.f32 %v729_v4, %v690_v44  ;;  %vm844_vm10 = vcmp.eq.f32.partialorder %v843_v16, 8.507059e+37  ;;  %vm809_vm12 = vweird.f32 %v1506_v53 }
 0x2d6   :  { %vm1537_vm14 = vcmp.eq.f32.partialorder %v813_v25, 8.507059e+37  ;;  %v816_v48 = vor.u32 1.1754944e-38, %v815_v30 }
 0x2d7   :  { %v1043_v55 = vpop.eup %1042  ;;  %v792_v9 = vmul.f32 %v1041_v63, %v791_v5  ;;  %754 = vst [vmem:[%s1612_s11 + $0x108] sm:$0xff] %v1512_v8  ;;  %v967_v12 = vmul.f32 -1.442695, %v1512_v8 }
 0x2d8   :  { %v1045_v10 = vpop.eup %1044  ;;  %v1514_v11 = vadd.f32 1.0, %v1043_v55 }
 0x2d9   :  { %v1047_v13 = vpop.eup %1046  ;;  %v793_v14 = vadd.f32 %v1041_v63, %v792_v9  ;;  %v835_v15 = vmul.f32 %v1045_v10, %v784_v51  ;;  %vm840_vm8 = vweird.f32 %v1045_v10 }
 0x2da   :  { %1050 = vrcp.f32 %v1514_v11  ;;  %v623_v0 = vpop.f32.mrf.mxu3  ;;  %v1049_v17 = vpop.eup %1048  ;;  %v1522_v21 = vadd.f32 1.0, %v1047_v13  ;;  %vm841_vm11 = vmor %vm839_vm9, %vm840_vm8  ;;  %v860_v33 = vand.u32 2147483648, %v1514_v11  ;;  %vm854_vm1 = vweird.f32 %v1514_v11 }
 0x2db   :  { %v797_v18 = vsel %vm796_vm6, %v1041_v63, %v793_v14  ;;  %v836_v19 = vsub.f32 1.0, %v835_v15  ;;  %1052 = vpow2.f32 %v967_v12  ;;  %635 = vst [vmem:[%s1612_s11 + $0xd0] sm:$0xff] %v623_v0  ;;  %v805_v24 = vmul.f32 %v1049_v17, %v1506_v53 }
 0x2dc   :  { %v802_v22 = vsel %vm799_vm7, %v801_v3, %v797_v18  ;;  %1054 = vrcp.f32 %v1522_v21  ;;  %v691_v32 = vmul.f32 %v1452_v29, %v623_v0  ;;  %vm810_vm13 = vweird.f32 %v1049_v17 }
 0x2dd   :  { %v909_v26 = vmul.f32 %v802_v22, %v1457_v34  ;;  %v837_v27 = vmul.f32 %v1045_v10, %v836_v19  ;;  %v806_v28 = vsub.f32 1.0, %v805_v24  ;;  %v846_v34 = vor.u32 1.1754944e-38, %v845_v23  ;;  %vm811_vm15 = vmor %vm809_vm12, %vm810_vm13 }
 0x2de   :  { %v1542_v45 = vadd.f32 %v734_v37, %v691_v32  ;;  %v830_v53 = vand.u32 2147483648, %v1522_v21  ;;  %v861_v4 = vor.u32 1.1754944e-38, %v860_v33  ;;  %v828_v6 = vand.u32 2147483647, %v1522_v21 }
 0x2df   :  { %917 = vst [vmem:[%s1612_s11 + $0x120] sm:$0xff] %v909_v26  ;;  %v838_v31 = vadd.f32 %v1045_v10, %v837_v27  ;;  %v807_v38 = vmul.f32 %v1049_v17, %v806_v28  ;;  %vm824_vm5 = vweird.f32 %v1522_v21 }
 0x2e0   :  { %v1051_v36 = vpop.eup %1050  ;;  %755 = vst [vmem:[%s1612_s11 + $0x110] sm:$0xff] %v1542_v45  ;;  %v968_v57 = vmul.f32 -1.442695, %v1542_v45  ;;  %v831_v12 = vor.u32 1.1754944e-38, %v830_v53  ;;  %vm829_vm7 = vcmp.eq.f32.partialorder %v828_v6, 8.507059e+37 }
 0x2e1   :  { %v1053_v39 = vpop.eup %1052  ;;  %v842_v40 = vsel %vm841_vm11, %v1045_v10, %v838_v31  ;;  %v850_v43 = vmul.f32 %v1051_v36, %v1514_v11  ;;  %v808_v29 = vadd.f32 %v1049_v17, %v807_v38  ;;  %vm855_vm0 = vweird.f32 %v1051_v36 }
 0x2e2   :  { %v847_v47 = vsel %vm844_vm10, %v846_v34, %v842_v40  ;;  %v1544_v49 = vadd.f32 1.0, %v1053_v39  ;;  %v626_v50 = vpop.f32.mrf.mxu3  ;;  %v1055_v52 = vpop.eup %1054  ;;  %vm856_vm3 = vmor %vm854_vm1, %vm855_vm0 }
 0x2e3   :  { %v912_v54 = vmul.f32 %v847_v47, %v1469_v42  ;;  %v851_v56 = vsub.f32 1.0, %v850_v43  ;;  %v692_v59 = vmul.f32 %v1459_v35, %v626_v50  ;;  %v812_v20 = vsel %vm811_vm15, %v1049_v17, %v808_v29  ;;  %636 = vst [vmem:[%s1612_s11 + $0xd8] sm:$0xff] %v626_v50 }
 0x2e4   :  { %v820_v51 = vmul.f32 %v1055_v52, %v1522_v21  ;;  %1056 = vrcp.f32 %v1544_v49  ;;  %v817_v42 = vsel %vm1537_vm14, %v816_v48, %v812_v20  ;;  %v858_v35 = vand.u32 2147483647, %v1514_v11 }
 0x2e5   :  { %920 = vst [vmem:[%s1612_s11 + $0x138] sm:$0xff] %v912_v54  ;;  %v852_v61 = vmul.f32 %v1051_v36, %v851_v56  ;;  %v910_v63 = vmul.f32 %v817_v42, %v1479_v46  ;;  %1058 = vpow2.f32 %v968_v57  ;;  %v1568_v44 = vadd.f32 %v739_v62, %v692_v59 }
 0x2e6   :  { %v821_v1 = vsub.f32 1.0, %v820_v51  ;;  %vm825_vm4 = vweird.f32 %v1055_v52  ;;  %vm859_vm2 = vcmp.eq.f32.partialorder %v858_v35, 8.507059e+37  ;;  %v875_v18 = vand.u32 2147483648, %v1544_v49 }
 0x2e7   :  { %v853_v2 = vadd.f32 %v1051_v36, %v852_v61  ;;  %918 = vst [vmem:[%s1612_s11 + $0x128] sm:$0xff] %v910_v63  ;;  %v969_v7 = vmul.f32 -1.442695, %v1568_v44  ;;  %vm826_vm6 = vmor %vm824_vm5, %vm825_vm4  ;;  %v873_v19 = vand.u32 2147483647, %v1544_v49  ;;  %vm869_vm9 = vweird.f32 %v1544_v49 }
 0x2e8   :  { %v822_v5 = vmul.f32 %v1055_v52, %v821_v1  ;;  %756 = vst [vmem:[%s1612_s11 + $0x118] sm:$0xff] %v1568_v44  ;;  %v876_v23 = vor.u32 1.1754944e-38, %v875_v18 }
 0x2e9   :  { %v857_v46 = vsel %vm856_vm3, %v1051_v36, %v853_v2  ;;  %1060 = vpow2.f32 %v969_v7  ;;  %vm874_vm11 = vcmp.eq.f32.partialorder %v873_v19, 8.507059e+37 }
 0x2ea   :  { %v1057_v55 = vpop.eup %1056  ;;  %v862_v9 = vsel %vm859_vm2, %v861_v4, %v857_v46  ;;  %v823_v10 = vadd.f32 %v1055_v52, %v822_v5 }
 0x2eb   :  { %v913_v11 = vmul.f32 %v862_v9, %v1489_v58  ;;  %v865_v13 = vmul.f32 %v1057_v55, %v1544_v49  ;;  %v1059_v14 = vpop.eup %1058  ;;  %vm870_vm8 = vweird.f32 %v1057_v55 }
 0x2ec   :  { %v827_v15 = vsel %vm826_vm6, %v1055_v52, %v823_v10  ;;  %v787_v0 = vadd.f32 1.0, %v1059_v14  ;;  %vm871_vm10 = vmor %vm869_vm9, %vm870_vm8 }
 0x2ed   :  { %921 = vst [vmem:[%s1612_s11 + $0x140] sm:$0xff] %v913_v11  ;;  %v832_v3 = vsel %vm829_vm7, %v831_v12, %v827_v15  ;;  %v866_v16 = vsub.f32 1.0, %v865_v13 }
 0x2ee   :  { %v911_v17 = vmul.f32 %v832_v3, %v1499_v60  ;;  %1062 = vrcp.f32 %v787_v0  ;;  %v890_v31 = vand.u32 2147483648, %v787_v0  ;;  %v888_v37 = vand.u32 2147483647, %v787_v0 }
 0x2ef   :  { %v867_v58 = vmul.f32 %v1057_v55, %v866_v16  ;;  %v1061_v21 = vpop.eup %1060  ;;  %vm884_vm13 = vweird.f32 %v787_v0 }
 0x2f0   :  { %919 = vst [vmem:[%s1612_s11 + $0x130] sm:$0xff] %v911_v17  ;;  %v788_v24 = vadd.f32 1.0, %v1061_v21  ;;  %v891_v39 = vor.u32 1.1754944e-38, %v890_v31  ;;  %vm889_vm15 = vcmp.eq.f32.partialorder %v888_v37, 8.507059e+37 }
 0x2f1   :  { %v868_v22 = vadd.f32 %v1057_v55, %v867_v58 }
 0x2f2   :  { %1064 = vrcp.f32 %v788_v24  ;;  %v903_v29 = vand.u32 2147483647, %v788_v24  ;;  %vm899_vm1 = vweird.f32 %v788_v24 }
 0x2f3   :  { %v872_v25 = vsel %vm871_vm10, %v1057_v55, %v868_v22 }
 0x2f4   :  { %v877_v60 = vsel %vm874_vm11, %v876_v23, %v872_v25  ;;  %v1063_v26 = vpop.eup %1062  ;;  %vm904_vm4 = vcmp.eq.f32.partialorder %v903_v29, 8.507059e+37 }
 0x2f5   :  { %v914_v27 = vmul.f32 %v877_v60, %v1512_v8  ;;  %v880_v28 = vmul.f32 %v1063_v26, %v787_v0  ;;  %vm885_vm12 = vweird.f32 %v1063_v26  ;;  %v905_v8 = vand.u32 2147483648, %v788_v24 }
 0x2f6   :  { %vm886_vm14 = vmor %vm884_vm13, %vm885_vm12 }
 0x2f7   :  { %922 = vst [vmem:[%s1612_s11 + $0x148] sm:$0xff] %v914_v27  ;;  %v881_v30 = vsub.f32 1.0, %v880_v28  ;;  %v906_v50 = vor.u32 1.1754944e-38, %v905_v8 }
 0x2f8   :  { %v1065_v32 = vpop.eup %1064 }
 0x2f9   :  { %v882_v36 = vmul.f32 %v1063_v26, %v881_v30  ;;  %v895_v34 = vmul.f32 %v1065_v32, %v788_v24  ;;  %vm900_vm0 = vweird.f32 %v1065_v32 }
 0x2fa   :  { %vm901_vm3 = vmor %vm899_vm1, %vm900_vm0 }
 0x2fb   :  { %v883_v38 = vadd.f32 %v1063_v26, %v882_v36  ;;  %v896_v40 = vsub.f32 1.0, %v895_v34 }
 0x2fd   :  { %v887_v41 = vsel %vm886_vm14, %v1063_v26, %v883_v38  ;;  %v897_v47 = vmul.f32 %v1065_v32, %v896_v40 }
 0x2fe   :  { %v892_v43 = vsel %vm889_vm15, %v891_v39, %v887_v41 }
 0x2ff   :  { %v915_v48 = vmul.f32 %v892_v43, %v1542_v45  ;;  %v898_v49 = vadd.f32 %v1065_v32, %v897_v47 }
 0x301   :  { %923 = vst [vmem:[%s1612_s11 + $0x150] sm:$0xff] %v915_v48  ;;  %v902_v52 = vsel %vm901_vm3, %v1065_v32, %v898_v49 }
 0x302   :  { %v907_v54 = vsel %vm904_vm4, %v906_v50, %v902_v52 }
 0x303   :  { %v916_v56 = vmul.f32 %v907_v54, %v1568_v44 }
 0x305   :  { %924 = vst [vmem:[%s1612_s11 + $0x158] sm:$0xff] %v916_v56 }

</bundles_post_ra>
